<compile_context>
chip_gen: v7x
topology: tpu7x:2x2x1
jax: 0.10.0
libtpu: 0.0.40
codegen_flags: <defaults>
</compile_context>

<pallas_src>
import jax
import jax.numpy as jnp
from jax.experimental import pallas as pl
from jax.experimental.pallas import tpu as pltpu


C_IN = 256   # conv1 in-channels (fixed by the module)
C_MID = 64   # conv1 out-channels
C_OUT = 1    # conv2 out-channels


def _netd_pixel_kernel(x_ref, w1_ref, w2_ref, o_ref):
    # x_ref : (1, C_IN, tile_hw)   channels-major activation tile (NCHW, HW flattened)
    # w1_ref: (C_MID, C_IN)        conv1 weight (64, 256), resident in VMEM
    # w2_ref: (C_OUT, C_MID)       conv2 weight (1, 64),   resident in VMEM
    # o_ref : (1, C_OUT, tile_hw)  lane-dense output tile
    x = x_ref[0]                                                      # (C_IN, tile_hw)
    h = jnp.dot(w1_ref[...], x, preferred_element_type=jnp.float32)   # (C_MID, tile_hw)
    h = jnp.maximum(h, 0.0)                                           # ReLU
    y = jnp.dot(w2_ref[...], h, preferred_element_type=jnp.float32)   # (C_OUT, tile_hw), lane-dense
    o_ref[0] = jax.nn.sigmoid(y).astype(o_ref.dtype)


def netd_pixel_pallas(x_nchw, w1, w2, *, tile_hw=2048, use_bf16=False):
    """Forward pass of netD_pixel.

    Args:
      x_nchw: (N, 256, H, W) float32 activations.
      w1:     (64, 256, 1, 1) conv1 weight (PyTorch OIHW layout).
      w2:     (1, 64, 1, 1)   conv2 weight (PyTorch OIHW layout).
      tile_hw: spatial (lane) tile width; multiple of 128.
      use_bf16: cast x and w1 to bf16 for the first matmul (f32 accumulation).
    Returns:
      (N, 1, H, W) float32.
    """
    N, C, H, W = x_nchw.shape
    assert C == C_IN
    HW = H * W

    # 1x1 conv weights (OIHW) are already (out, in) after dropping the 1x1 taps
    # -> no transpose needed in this orientation.
    w1_mat = w1[:, :, 0, 0]                          # (64, 256)
    w2_mat = w2[:, :, 0, 0].astype(jnp.float32)      # (1, 64) — tiny, keep f32

    # Keep NCHW: flatten spatial dims only; HW becomes the lane axis in the kernel.
    x_flat = x_nchw.reshape(N, C_IN, HW)

    if use_bf16:
        x_flat = x_flat.astype(jnp.bfloat16)
        w1_mat = w1_mat.astype(jnp.bfloat16)
    else:
        x_flat = x_flat.astype(jnp.float32)
        w1_mat = w1_mat.astype(jnp.float32)

    # Pad HW up to a multiple of 128 lanes, then pick the tile size.
    hw_128 = pl.cdiv(HW, 128) * 128
    tile_hw = max(128, min(int(tile_hw), hw_128))
    tile_hw = (tile_hw // 128) * 128
    hw_pad = pl.cdiv(HW, tile_hw) * tile_hw
    if hw_pad != HW:
        # Padded columns produce sigmoid(0)=0.5 and are sliced off below.
        x_flat = jnp.pad(x_flat, ((0, 0), (0, 0), (0, hw_pad - HW)))

    grid = (N, hw_pad // tile_hw)

    in_bytes = jnp.dtype(x_flat.dtype).itemsize
    cost = pl.CostEstimate(
        flops=2 * N * hw_pad * (C_IN * C_MID + C_MID * C_OUT),
        transcendentals=N * hw_pad,  # sigmoid
        bytes_accessed=(N * hw_pad * C_IN * in_bytes          # x read
                        + N * hw_pad * C_OUT * 4              # output write
                        + C_MID * C_IN * in_bytes             # w1
                        + C_OUT * C_MID * 4),                 # w2
    )

    out = pl.pallas_call(
        _netd_pixel_kernel,
        out_shape=jax.ShapeDtypeStruct((N, C_OUT, hw_pad), jnp.float32),
        grid_spec=pltpu.PrefetchScalarGridSpec(
            num_scalar_prefetch=0,
            grid=grid,
            in_specs=[
                pl.BlockSpec((1, C_IN, tile_hw), lambda n, j: (n, 0, j)),
                pl.BlockSpec((C_MID, C_IN), lambda n, j: (0, 0)),
                pl.BlockSpec((C_OUT, C_MID), lambda n, j: (0, 0)),
            ],
            out_specs=pl.BlockSpec((1, C_OUT, tile_hw), lambda n, j: (n, 0, j)),
        ),
        compiler_params=pltpu.CompilerParams(
            dimension_semantics=("parallel", "parallel"),
        ),
        cost_estimate=cost,
    )(x_flat, w1_mat, w2_mat)

    # Drop spatial padding and restore (N, 1, H, W).
    return out[:, :, :HW].reshape(N, C_OUT, H, W)


def _reference_jax(x_nchw, w1, w2):
    # Plain-JAX reference of the same math (1x1 convs as channel contractions).
    h = jnp.einsum("oi,nihw->nohw", w1[:, :, 0, 0], x_nchw)
    h = jnp.maximum(h, 0.0)
    y = jnp.einsum("oi,nihw->nohw", w2[:, :, 0, 0], h)
    return jax.nn.sigmoid(y)


if __name__ == "__main__":
    key = jax.random.PRNGKey(0)
    kx, k1, k2 = jax.random.split(key, 3)

    # small spatial dims; in-channels fixed at 256 by the module definition
    N, H, W = 2, 8, 8
    x = jax.random.normal(kx, (N, C_IN, H, W), dtype=jnp.float32)

    # normal_init(m, 0, 0.1): weight ~ N(0, 0.1)
    w1 = 0.1 * jax.random.normal(k1, (C_MID, C_IN, 1, 1), dtype=jnp.float32)
    w2 = 0.1 * jax.random.normal(k2, (C_OUT, C_MID, 1, 1), dtype=jnp.float32)

    ref = _reference_jax(x, w1, w2)

    # f32 path — tight tolerance
    out = jax.block_until_ready(netd_pixel_pallas(x, w1, w2))
    assert out.shape == (N, 1, H, W)
    assert jnp.allclose(out, ref, atol=1e-5, rtol=1e-5)

    # bf16-input path (halved HBM reads) — looser tolerance, f32 accumulation
    out_bf16 = jax.block_until_ready(netd_pixel_pallas(x, w1, w2, use_bf16=True))
    assert out_bf16.shape == (N, 1, H, W)
    assert jnp.allclose(out_bf16, ref, atol=2e-2, rtol=2e-2)

    print("KERNEL_OK")
</pallas_src>

<mosaic_0001>
module attributes {stable_mosaic.version = 11 : i64} {
  func.func @_netd_pixel_kernel(%arg0: i32, %arg1: i32, %arg2: memref<1x256x128xf32, #tpu.memory_space<vmem>>, %arg3: memref<64x256xf32, #tpu.memory_space<vmem>>, %arg4: memref<1x64xf32, #tpu.memory_space<vmem>>, %arg5: memref<1x1x128xf32, #tpu.memory_space<vmem>>) attributes {dimension_semantics = [#tpu.dimension_semantics<parallel>, #tpu.dimension_semantics<parallel>], iteration_bounds = array<i64: 2, 1>, scalar_prefetch = 0 : i64, scratch_operands = 0 : i64, tpu.core_type = #tpu.core_type<tc>, window_params = [{transform_indices = @transform_0, window_bounds = array<i64: 1, 256, 128>}, {pipeline_mode = #tpu.pipeline_mode<synchronous>, transform_indices = @transform_1, window_bounds = array<i64: 64, 256>}, {pipeline_mode = #tpu.pipeline_mode<synchronous>, transform_indices = @transform_2, window_bounds = array<i64: 1, 64>}, {transform_indices = @transform_3, window_bounds = array<i64: 1, 1, 128>}]} {
    %c0 = arith.constant 0 : index
    %c0_0 = arith.constant 0 : index
    %c0_1 = arith.constant 0 : index
    %0 = vector.load %arg2[%c0, %c0_0, %c0_1] : memref<1x256x128xf32, #tpu.memory_space<vmem>>, vector<1x256x128xf32>
    %1 = vector.shape_cast %0 : vector<1x256x128xf32> to vector<256x128xf32>
    %c0_2 = arith.constant 0 : index
    %c0_3 = arith.constant 0 : index
    %2 = vector.load %arg3[%c0_2, %c0_3] : memref<64x256xf32, #tpu.memory_space<vmem>>, vector<64x256xf32>
    %cst = arith.constant dense<0.000000e+00> : vector<64x128xf32>
    %3 = tpu.matmul %2, %1, %cst {dimension_numbers = #tpu.dot_dimension_numbers<[1], [0], [0], [1], [0, 0, 1, 1], [], []>} : vector<64x256xf32>, vector<256x128xf32>, vector<64x128xf32> -> vector<64x128xf32>
    %cst_4 = arith.constant 0.000000e+00 : f32
    %4 = vector.broadcast %cst_4 : f32 to vector<64x128xf32>
    %5 = arith.maximumf %3, %4 : vector<64x128xf32>
    %c0_5 = arith.constant 0 : index
    %c0_6 = arith.constant 0 : index
    %6 = vector.load %arg4[%c0_5, %c0_6] : memref<1x64xf32, #tpu.memory_space<vmem>>, vector<1x64xf32>
    %cst_7 = arith.constant dense<0.000000e+00> : vector<1x128xf32>
    %7 = tpu.matmul %6, %5, %cst_7 {dimension_numbers = #tpu.dot_dimension_numbers<[1], [0], [0], [1], [0, 0, 1, 1], [], []>} : vector<1x64xf32>, vector<64x128xf32>, vector<1x128xf32> -> vector<1x128xf32>
    %8 = arith.negf %7 : vector<1x128xf32>
    %9 = math.exp %8 : vector<1x128xf32>
    %cst_8 = arith.constant 1.000000e+00 : f32
    %10 = vector.broadcast %cst_8 : f32 to vector<1x128xf32>
    %11 = arith.addf %10, %9 : vector<1x128xf32>
    %12 = arith.divf %10, %11 : vector<1x128xf32>
    %c0_9 = arith.constant 0 : index
    %c0_10 = arith.constant 0 : index
    %c0_11 = arith.constant 0 : index
    %13 = vector.load %arg5[%c0_9, %c0_10, %c0_11] : memref<1x1x128xf32, #tpu.memory_space<vmem>>, vector<1x1x128xf32>
    %14 = vector.shape_cast %13 : vector<1x1x128xf32> to vector<1x128xf32>
    %15 = vector.shape_cast %12 : vector<1x128xf32> to vector<1x1x128xf32>
    tpu.vector_store %arg5[%c0_9, %c0_10, %c0_11], %15 {strides = array<i32>} : memref<1x1x128xf32, #tpu.memory_space<vmem>>, vector<1x1x128xf32>,
    return
  }
  func.func @transform_0(%arg0: i32, %arg1: i32) -> (i32, i32, i32) {
    %c0_i32 = arith.constant 0 : i32
    %c0_i32_0 = arith.constant 0 : i32
    return %arg0, %c0_i32, %arg1 : i32, i32, i32
  }
  func.func @transform_1(%arg0: i32, %arg1: i32) -> (i32, i32) {
    %c0_i32 = arith.constant 0 : i32
    %c0_i32_0 = arith.constant 0 : i32
    %c0_i32_1 = arith.constant 0 : i32
    return %c0_i32, %c0_i32_0 : i32, i32
  }
  func.func @transform_2(%arg0: i32, %arg1: i32) -> (i32, i32) {
    %c0_i32 = arith.constant 0 : i32
    %c0_i32_0 = arith.constant 0 : i32
    %c0_i32_1 = arith.constant 0 : i32
    return %c0_i32, %c0_i32_0 : i32, i32
  }
  func.func @transform_3(%arg0: i32, %arg1: i32) -> (i32, i32, i32) {
    %c0_i32 = arith.constant 0 : i32
    %c0_i32_0 = arith.constant 0 : i32
    return %arg0, %c0_i32, %arg1 : i32, i32, i32
  }
}

</mosaic_0001>

<bundles_post_ra>
// kernel: tpu_custom_call.1
= control target key start
LH: loop header
LB: loop body
LE: loop exit
PB: predicated region body
PF: predicated region fallthrough
CT: control target
= control target key end

     0   :  { %8 = vsyncpa [#allocation3], 0  ;;  %s1224_s0 = inlined_call_operand.hbm [shape: f32[2,256,128], index: 0, kind: input, shape index: {}]   ;;  %s1225_s1 = inlined_call_operand.hbm [shape: f32[64,256], index: 1, kind: input, shape index: {}]   ;;  %s1226_s2 = inlined_call_operand.vmem [shape: f32[1,64], index: 2, kind: input, shape index: {}]   ;;  %s1227_s3 = inlined_call_operand.hbm [shape: f32[2,1,128], index: 3, kind: output, shape index: {}]  }
   0x1   :  { %10 = vsyncpa [#allocation3 + $0x1], 0 }
   0x2   :  { %11 = vsyncpa [#allocation6], 0 }
   0x3   :  { %12 = vsyncpa [#allocation4], 0 }
   0x4   :  { %14 = vsyncpa [#allocation4 + $0x1], 0  ;;  %s969_s12 = smov 0   ;;  %s971_s13 = smov 0  }
   0x5   :  { %s973_s14 = smov 0   ;;  %s975_s15 = smov 0  }
   0x6   :  { %s977_s16 = smov 0   ;;  %s979_s17 = smov 0  }
   0x7 LB: > { %s564_s18 = sadd.s32 4294967295, %s937_s17   ;;  %s565_s19 = sadd.s32 4294967294, %s937_s17   ;;  %s937_s17 = sphi %s979_s17, %s20_s17   ;;  %s933_s16 = sphi %s977_s16, %s1251_s16   ;;  %s929_s15 = sphi %s975_s15, %s1250_s15   ;;  %s925_s14 = sphi %s973_s14, %s1249_s14   ;;  %s921_s13 = sphi %s971_s13, %s1248_s13   ;;  %s917_s12 = sphi %s969_s12, %s1247_s12  }
   0x8   : > { %p54_p0 = scmp.ne.s32.totalorder %s921_s13, %s917_s12  ;;  %p1003_p1 = scmp.eq.s32.totalorder %s564_s18, 0 }
   0x9   : > { %p1007_p2 = scmp.eq.s32.totalorder %s564_s18, 1  ;;  %p128_p3 = scmp.eq.s32.totalorder %s565_s19, 1 }
   0xa   : > { %s1232_s20 = scalar_select %p1003_p1, 1, 0 }
   0xb   : > { %s1233_s21 = scalar_select %p1007_p2, 1, 0 }
   0xc   : > { %p1013_p4 = por %p1003_p1, %p54_p0  ;;  %p566_p5 = scmp.ge.s32.totalorder %s937_s17, 1 }
   0xd   : > { %p1018_p6 = por %p128_p3, %p54_p0  ;;  %p135_p7 = scmp.lt.s32.totalorder %s937_s17, 3 }
   0xe   : > { %s1234_s22 = scalar_select %p1013_p4, 1, 0 }
   0xf   : > { %s1235_s23 = scalar_select %p1018_p6, 1, 0 }
  0x10   : > { %p1023_p8 = pnand %p566_p5, %p135_p7  ;;  %s939_s25 = smov [#allocation5]  }
  0x11   : > { %s147_s26 = sshll.u32 %s939_s25, 4  ;;  %s32_s28 = sadd.s32 1, %s933_s16  ;;  %s148_s26 = int_to_ptr.vmem [resolvable:$true] %s147_s26 }
  0x12   : > { %s1236_s24 = scalar_select %p1023_p8, 1, 0 }
  0x13   : > { %p717_p9 = pneg %p1023_p8  ;;  %s793_s4 = scalar_lea.hbm %s1225_s1, 2048 }
  0x14   : > { %p794_p12 = scmp.ne.s32.totalorder %s1225_s1, %s793_s4  ;;  %p800_p5 = scmp.lt.u32.totalorder %s793_s4, %s1225_s1 }
  0x15   : > { %p1032_p11 = pnand %p717_p9, %p1003_p1 }
  0x17   : > { %p795_p13 = pneg %p1032_p11 }
  0x19   : > { %p796_p0 = pnand %p795_p13, %p794_p12 }
  0x1b   : > { %p797_p3 = pneg %p796_p0 }
  0x1d   : > { %p802_p7 = pnand %p800_p5, %p797_p3 }
  0x1f   : > { %805 = shalt.err (!%p802_p7)
}
  0x20   : > { %s806_s9 = scalar_lea.vmem %s148_s26, 2048  ;;  %p814_p1 = scmp.lt.s32.totalorder %s148_s26, %s148_s26 }
  0x21   : > { %p807_p9 = scmp.ne.s32.totalorder %s148_s26, %s806_s9  ;;  %p815_p4 = scmp.lt.s32.totalorder %s806_s9, %s806_s9 }
  0x23   : > { %p809_p10 = pnand %p807_p9, %p795_p13  ;;  %p816_p8 = por %p815_p4, %p814_p1 }
  0x25   : > { %p810_p6 = pneg %p809_p10 }
  0x27   : > { %p817_p2 = pnand %p816_p8, %p810_p6 }
  0x29   : > { %820 = shalt.err (!%p817_p2)
}
  0x2a   : > { %s940_s10 = smov 256   ;;  %s941_s11 = smov 16  }
  0x2b   : > { %720 = dma.hbm_to_vmem [thread:$0]  (!%p1032_p11), %s1225_s1, 2048, %s148_s26, [#allocation6], %s940_s10, %s940_s10, %s941_s11  }
  0x2c   : > { %p34_p1 = scmp.ge.s32.totalorder %s32_s28, 2  ;;  %s41_s25 = sadd.s32 1, %s925_s14 }
  0x2d   : > { %p48_p2 = scmp.ne.s32.totalorder %s925_s14, %s921_s13  ;;  %p49_p4 = scmp.eq.s32.totalorder %s937_s17, 0 }
  0x2e   : > { %s1253_s28 = smov (%p34_p1, %s32_s28), 0  ;;  %p1239_p8 = scmp.ne.s32.totalorder %s1233_s21, 0 }
  0x2f   : > { %p1059_p6 = por %p49_p4, %p48_p2  ;;  %s36_s27 = ssub.s32 %s933_s16, %s1253_s28 }
  0x30   : > { %p1065_p10 = por %p1239_p8, %p48_p2  ;;  %p730_p12 = scmp.lt.s32.totalorder %s937_s17, 2 }
  0x31   : > { %p39_p11 = scmp.eq.s32.totalorder %s36_s27, 0  ;;  %s164_s26 = sand.u32 1, %s925_s14  }
  0x32   : > { %s569_s4 = sshll.u32 %s164_s26, 8  ;;  %s580_s6 = sshll.u32 %s933_s16, 12 }
  0x33   : > { %s1074_s5 = scalar_select %p39_p11, %s925_s14, %s41_s25  }
  0x34   : > { %s1080_s9 = scalar_lea.hbm %s1224_s0, %s580_s6  ;;  %s168_s21 = scalar_lea.vmem [#allocation2], %s569_s4 }
  0x35   : > { %s176_s10 = sshll.u32 %s168_s21, 4  ;;  %p1086_p13 = pnand %p730_p12, %p1059_p6  ;;  %s1082_s10 = int_to_ptr.vmem [resolvable:$true] %s176_s10 }
  0x36   : > { %s1090_s18 = scalar_lea.sflag [#allocation3], %s164_s26  ;;  %s821_s19 = scalar_lea.hbm %s1080_s9, 4096 }
  0x37   : > { %p822_p0 = scmp.ne.s32.totalorder %s1080_s9, %s821_s19  ;;  %p823_p3 = pneg %p1086_p13 }
  0x38   : > { %s826_s29 = scalar_lea.hbm %s1224_s0, 8192  ;;  %p827_p9 = scmp.lt.u32.totalorder %s1080_s9, %s1224_s0 }
  0x39   : > { %p824_p5 = pnand %p823_p3, %p822_p0  ;;  %p828_p1 = scmp.lt.u32.totalorder %s826_s29, %s821_s19 }
  0x3a   : > { %p830_p4 = scmp.lt.u32.totalorder %s821_s19, %s1080_s9 }
  0x3b   : > { %p825_p7 = pneg %p824_p5  ;;  %p829_p2 = por %p828_p1, %p827_p9 }
  0x3d   : > { %p831_p6 = por %p830_p4, %p829_p2 }
  0x3f   : > { %p832_p8 = pnand %p831_p6, %p825_p7 }
  0x41   : > { %835 = shalt.err (!%p832_p8)
}
  0x42   : > { %s836_s26 = scalar_lea.vmem %s1082_s10, 4096  ;;  %s942_s7 = smov [#allocation2]  }
  0x43   : > { %p837_p12 = scmp.ne.s32.totalorder %s1082_s10, %s836_s26  ;;  %s841_s8 = sshll.u32 %s942_s7, 4  ;;  %s842_s8 = int_to_ptr.vmem [resolvable:$false] %s841_s8 }
  0x44   : > { %s843_s21 = scalar_lea.vmem %s842_s8, 8192  ;;  %p844_p5 = scmp.lt.s32.totalorder %s1082_s10, %s842_s8 }
  0x45   : > { %p839_p11 = pnand %p837_p12, %p823_p3  ;;  %p845_p9 = scmp.lt.s32.totalorder %s843_s21, %s836_s26 }
  0x47   : > { %p840_p0 = pneg %p839_p11  ;;  %p846_p1 = por %p845_p9, %p844_p5 }
  0x49   : > { %p847_p2 = pnand %p846_p1, %p840_p0 }
  0x4b   : > { %850 = shalt.err (!%p847_p2)
}
  0x4c   : > { %s943_s19 = smov 128   ;;  %s944_s25 = smov 8  }
  0x4d   : > { %724 = dma.hbm_to_vmem [thread:$0]  (!%p1086_p13), %s1080_s9, 4096, %s1082_s10, %s1090_s18, %s943_s19, %s943_s19, %s944_s25  }
  0x4e   : > { %p1242_p3 = scmp.ne.s32.totalorder %s1236_s24, 0 }
  0x4f   : > { %s1121_s27 = sand.u32 (!%p1242_p3), 1, %s921_s13   ;;  %p1243_p7 = scmp.ne.s32.totalorder (!%p1242_p3), %s1234_s22, 0 }
  0x50   : > { %188 = sbr.rel (%p1242_p3) target bundleno = 628 (0x274), region = 32  ;;  %s573_s29 = sshll.u32 (!%p1242_p3), %s1121_s27, 8 }
  0x51   : > { %s191_s4 = scalar_lea.sflag (!%p1242_p3), [#allocation3], %s1121_s27  ;;  %s1125_s6 = scalar_lea.vmem (!%p1242_p3), [#allocation2], %s573_s29 }
  0x57   : > { %904 = dma.done.wait (%p1243_p7), %s191_s4, 4096  }
  0x58   : > { %906 = vsyncadd (%p1243_p7), %s191_s4, 4294963200  ;;  %p1244_p13 = scmp.ne.s32.totalorder %s1232_s20, 0 }
  0x5a   : > { %908 = dma.done.wait (%p1244_p13), [#allocation6], 2048  }
  0x5b   : > { %910 = vsyncadd (%p1244_p13), [#allocation6], 4294965248  ;;  %v236_v0 = vld [vmem:[%s1125_s6 + $0x80] sm:$0xff]  ;;  %v237_v1 = vld [vmem:[%s1125_s6 + $0x88] sm:$0xff]  ;;  %vm946_vm0 = vmmov 0   ;;  %vm382_vm1 = vcmask 523264  }
  0x5c   : > { %v220_v2 = vld [vmem:[%s1125_s6] sm:$0xff]  ;;  %v665_v3 = vpack.c.bf16 %v237_v1, %v236_v0  ;;  %v221_v4 = vld [vmem:[%s1125_s6 + $0x8] sm:$0xff]  ;;  %v238_v5 = vld [vmem:[%s1125_s6 + $0x90] sm:$0xff]  ;;  %v945_v0 = vmov 0.0|0.0   ;;  %v947_v1 = vmov 0.0   ;;  %s577_s24 = sshll.u32 %s929_s15, 4 }
  0x5d   : > { %v239_v6 = vld [vmem:[%s1125_s6 + $0x98] sm:$0xff]  ;;  %v667_v7 = vpack.c.bf16 %v221_v4, %v220_v2  ;;  %v222_v9 = vld [vmem:[%s1125_s6 + $0x10] sm:$0xff]  ;;  %v240_v11 = vld [vmem:[%s1125_s6 + $0xa0] sm:$0xff]  ;;  %697 = vmatprep.subr.bf16.mxu1 %v945_v0  ;;  %662 = vmatprep.mubr.msk.f32.mxu1 %vm946_vm0, %v947_v1  ;;  %s219_s9 = scalar_lea.vmem [#allocation7], %s1121_s27  ;;  %s1175_s26 = scalar_lea.hbm %s1227_s3, %s577_s24 }
  0x5e   : > { %v669_v8 = vpack.c.bf16 %v239_v6, %v238_v5  ;;  %v223_v10 = vld [vmem:[%s1125_s6 + $0x18] sm:$0xff]  ;;  %666 = vmatprep.subr.bf16.mxu0 %v665_v3  ;;  %v241_v12 = vld [vmem:[%s1125_s6 + $0xa8] sm:$0xff]  ;;  %v224_v15 = vld [vmem:[%s1125_s6 + $0x20] sm:$0xff]  ;;  %s477_s10 = sshll.u32 %s219_s9, 4  ;;  %s464_s7 = scalar_lea.sflag [#allocation4], %s1121_s27  ;;  %s1177_s10 = int_to_ptr.vmem [resolvable:$true] %s477_s10 }
  0x5f   : > { %668 = vmatpush3.bf16.msra.mxu0 %v667_v7  ;;  %v671_v13 = vpack.c.bf16 %v223_v10, %v222_v9  ;;  %v673_v14 = vpack.c.bf16 %v241_v12, %v240_v11  ;;  %v225_v16 = vld [vmem:[%s1125_s6 + $0x28] sm:$0xff]  ;;  %v242_v17 = vld [vmem:[%s1125_s6 + $0xb0] sm:$0xff]  ;;  %v243_v18 = vld [vmem:[%s1125_s6 + $0xb8] sm:$0xff]  ;;  %s851_s8 = scalar_lea.vmem %s1177_s10, 16  ;;  %s948_s15 = smov [#allocation7]  }
  0x60   : > { %670 = vmatprep.subr.bf16.mxu0 %v669_v8  ;;  %v675_v19 = vpack.c.bf16 %v225_v16, %v224_v15  ;;  %v677_v20 = vpack.c.bf16 %v243_v18, %v242_v17  ;;  %v226_v21 = vld [vmem:[%s1125_s6 + $0x30] sm:$0xff]  ;;  %v227_v22 = vld [vmem:[%s1125_s6 + $0x38] sm:$0xff]  ;;  %v244_v23 = vld [vmem:[%s1125_s6 + $0xc0] sm:$0xff]  ;;  %p852_p4 = scmp.ne.s32.totalorder %s1177_s10, %s851_s8  ;;  %s855_s21 = sshll.u32 %s948_s15, 4  ;;  %s856_s21 = int_to_ptr.vmem [resolvable:$false] %s855_s21 }
  0x61   : > { %v245_v24 = vld [vmem:[%s1125_s6 + $0xc8] sm:$0xff]  ;;  %v679_v26 = vpack.c.bf16 %v227_v22, %v226_v21  ;;  %v228_v28 = vld [vmem:[%s1125_s6 + $0x40] sm:$0xff]  ;;  %v246_v30 = vld [vmem:[%s1125_s6 + $0xd0] sm:$0xff]  ;;  %s857_s19 = scalar_lea.vmem %s856_s21, 32  ;;  %p858_p12 = scmp.lt.s32.totalorder %s1177_s10, %s856_s21 }
  0x62   : > { %v253_v25 = vld [vmem:[#allocation5 + $0x8] sm:$0xff]  ;;  %v681_v27 = vpack.c.bf16 %v245_v24, %v244_v23  ;;  %v247_v31 = vld [vmem:[%s1125_s6 + $0xd8] sm:$0xff]  ;;  %v230_v34 = vld [vmem:[%s1125_s6 + $0x50] sm:$0xff]  ;;  %p853_p6 = pnand %p852_p4, %p1065_p10  ;;  %p859_p11 = scmp.lt.s32.totalorder %s857_s19, %s851_s8 }
  0x63   : > { %672 = vmatpush3.bf16.msra.mxu0 %v671_v13  ;;  %332 = vmatprep.mubr.f32.mxu0 %v253_v25  ;;  %v229_v29 = vld [vmem:[%s1125_s6 + $0x48] sm:$0xff]  ;;  %v685_v33 = vpack.c.bf16 %v247_v31, %v246_v30  ;;  %v231_v35 = vld [vmem:[%s1125_s6 + $0x58] sm:$0xff]  ;;  %v248_v36 = vld [vmem:[%s1125_s6 + $0xe0] sm:$0xff] }
  0x64   : > { %674 = vmatprep.subr.bf16.mxu0 %v673_v14  ;;  %v683_v32 = vpack.c.bf16 %v229_v29, %v228_v28  ;;  %v249_v37 = vld [vmem:[%s1125_s6 + $0xe8] sm:$0xff]  ;;  %v687_v38 = vpack.c.bf16 %v231_v35, %v230_v34  ;;  %v232_v40 = vld [vmem:[%s1125_s6 + $0x60] sm:$0xff]  ;;  %v250_v42 = vld [vmem:[%s1125_s6 + $0xf0] sm:$0xff]  ;;  %p854_p8 = pneg %p853_p6  ;;  %p860_p0 = por %p859_p11, %p858_p12 }
  0x65   : > { %v689_v39 = vpack.c.bf16 %v249_v37, %v248_v36  ;;  %v233_v41 = vld [vmem:[%s1125_s6 + $0x68] sm:$0xff]  ;;  %v251_v43 = vld [vmem:[%s1125_s6 + $0xf8] sm:$0xff]  ;;  %v234_v46 = vld [vmem:[%s1125_s6 + $0x70] sm:$0xff] }
  0x66   : > { %v691_v44 = vpack.c.bf16 %v233_v41, %v232_v40  ;;  %v693_v45 = vpack.c.bf16 %v251_v43, %v250_v42  ;;  %v235_v47 = vld [vmem:[%s1125_s6 + $0x78] sm:$0xff]  ;;  %v252_v49 = vld [vmem:[#allocation5] sm:$0xff]  ;;  %v254_v51 = vld [vmem:[#allocation5 + $0x10] sm:$0xff]  ;;  %p861_p5 = pnand %p860_p0, %p854_p8 }
  0x67   : > { %676 = vmatpush3.bf16.msra.mxu0 %v675_v19  ;;  %v695_v48 = vpack.c.bf16 %v235_v47, %v234_v46  ;;  %v255_v50 = vld [vmem:[#allocation5 + $0x18] sm:$0xff]  ;;  %v257_v52 = vld [vmem:[#allocation5 + $0x28] sm:$0xff]  ;;  %v256_v53 = vld [vmem:[#allocation5 + $0x20] sm:$0xff] }
  0x68   : > { %678 = vmatprep.subr.bf16.mxu0 %v677_v20  ;;  %v259_v54 = vld [vmem:[#allocation5 + $0x38] sm:$0xff]  ;;  %v258_v55 = vld [vmem:[#allocation5 + $0x30] sm:$0xff]  ;;  %v261_v56 = vld [vmem:[#allocation5 + $0x48] sm:$0xff] }
  0x69   : > { %v260_v57 = vld [vmem:[#allocation5 + $0x40] sm:$0xff]  ;;  %v263_v58 = vld [vmem:[#allocation5 + $0x58] sm:$0xff]  ;;  %v262_v59 = vld [vmem:[#allocation5 + $0x50] sm:$0xff] }
  0x6a   : > { %v265_v60 = vld [vmem:[#allocation5 + $0x68] sm:$0xff]  ;;  %v264_v61 = vld [vmem:[#allocation5 + $0x60] sm:$0xff]  ;;  %v267_v62 = vld [vmem:[#allocation5 + $0x78] sm:$0xff] }
  0x6b   : > { %680 = vmatpush3.bf16.msra.mxu0 %v679_v26  ;;  %v266_v63 = vld [vmem:[#allocation5 + $0x70] sm:$0xff] }
  0x6c   : > { %682 = vmatprep.subr.bf16.mxu0 %v681_v27 }
  0x6f   : > { %684 = vmatpush3.bf16.msra.mxu0 %v683_v32 }
  0x70   : > { %686 = vmatprep.subr.bf16.mxu0 %v685_v33 }
  0x73   : > { %688 = vmatpush3.bf16.msra.mxu0 %v687_v38  ;;  %v381_v38 = vld [vmem:[%s1226_s2] sm:$0x1] }
  0x74   : > { %690 = vmatprep.subr.bf16.mxu0 %v689_v39 }
  0x77   : > { %692 = vmatpush3.bf16.msra.mxu0 %v691_v44 }
  0x78   : > { %694 = vmatprep.subr.bf16.mxu0 %v693_v45 }
  0x7b   : > { %696 = vmatpush3.bf16.msra.mxu0 %v695_v48 }
  0x7e   : > { %333 = vmatmul.mubr.f32.vlgmr.msra.gmra.mrb[0].mxu0 %v252_v49 }
  0x7f   : > { %337 = vmatprep.mubr.f32.mxu0 %v255_v50 }
  0x82   : > { %338 = vmatmul.mubr.f32.gmra.mrb[2].mxu0 %v254_v51 }
  0x83   : > { %342 = vmatprep.mubr.f32.mxu0 %v257_v52 }
  0x86   : > { %343 = vmatmul.mubr.f32.gmra.mrb[4].mxu0 %v256_v53 }
  0x87   : > { %347 = vmatprep.mubr.f32.mxu0 %v259_v54 }
  0x8a   : > { %348 = vmatmul.mubr.f32.gmra.mrb[6].mxu0 %v258_v55 }
  0x8b   : > { %352 = vmatprep.mubr.f32.mxu0 %v261_v56 }
  0x8e   : > { %353 = vmatmul.mubr.f32.gmra.mrb[8].mxu0 %v260_v57 }
  0x8f   : > { %357 = vmatprep.mubr.f32.mxu0 %v263_v58 }
  0x92   : > { %358 = vmatmul.mubr.f32.gmra.mrb[10].mxu0 %v262_v59 }
  0x93   : > { %362 = vmatprep.mubr.f32.mxu0 %v265_v60 }
  0x96   : > { %363 = vmatmul.mubr.f32.gmra.mrb[12].mxu0 %v264_v61 }
  0x97   : > { %367 = vmatprep.mubr.f32.mxu0 %v267_v62 }
  0x9a   : > { %368 = vmatmul.mubr.f32.gmra.mrb[14].mxu0 %v266_v63 }
 0x151   : > { %v613_v2 = vpop.f32.mrb[0].mxu0 }
 0x152   : > { %v614_v3 = vpop.f32.mrb[1].mxu0 }
 0x153   : > { %v615_v4 = vadd.f32 %v614_v3, %v613_v2 }
 0x155   : > { %v616_v5 = vpop.f32.mrb[2].mxu0  ;;  %v373_v8 = vmax.f32 %v615_v4, 0.0 }
 0x156   : > { %v617_v6 = vpop.f32.mrb[3].mxu0 }
 0x157   : > { %v618_v7 = vadd.f32 %v617_v6, %v616_v5 }
 0x159   : > { %v374_v9 = vmax.f32 %v618_v7, 0.0  ;;  %v619_v10 = vpop.f32.mrb[4].mxu0 }
 0x15a   : > { %v620_v11 = vpop.f32.mrb[5].mxu0 }
 0x15b   : > { %v621_v12 = vadd.f32 %v620_v11, %v619_v10  ;;  %v698_v13 = vpack.c.bf16 %v374_v9, %v373_v8 }
 0x15d   : > { %v622_v14 = vpop.f32.mrb[6].mxu0  ;;  %699 = vmatpush3.bf16.msra.mxu1 %v698_v13  ;;  %v375_v17 = vmax.f32 %v621_v12, 0.0 }
 0x15e   : > { %v623_v15 = vpop.f32.mrb[7].mxu0  ;;  %700 = vmatprep.subr.bf16.mxu1 %v945_v0 }
 0x15f   : > { %v624_v16 = vadd.f32 %v623_v15, %v622_v14 }
 0x161   : > { %v376_v18 = vmax.f32 %v624_v16, 0.0  ;;  %v625_v19 = vpop.f32.mrb[8].mxu0 }
 0x162   : > { %v626_v20 = vpop.f32.mrb[9].mxu0 }
 0x163   : > { %v701_v21 = vpack.c.bf16 %v376_v18, %v375_v17  ;;  %v627_v22 = vadd.f32 %v626_v20, %v625_v19 }
 0x165   : > { %v628_v23 = vpop.f32.mrb[10].mxu0  ;;  %702 = vmatpush3.bf16.msra.mxu1 %v701_v21  ;;  %v377_v26 = vmax.f32 %v627_v22, 0.0 }
 0x166   : > { %v629_v24 = vpop.f32.mrb[11].mxu0  ;;  %703 = vmatprep.subr.bf16.mxu1 %v945_v0 }
 0x167   : > { %v630_v25 = vadd.f32 %v629_v24, %v628_v23 }
 0x169   : > { %v378_v27 = vmax.f32 %v630_v25, 0.0  ;;  %v631_v28 = vpop.f32.mrb[12].mxu0 }
 0x16a   : > { %v632_v29 = vpop.f32.mrb[13].mxu0 }
 0x16b   : > { %v704_v30 = vpack.c.bf16 %v378_v27, %v377_v26  ;;  %v633_v31 = vadd.f32 %v632_v29, %v631_v28 }
 0x16d   : > { %v634_v32 = vpop.f32.mrb[14].mxu0  ;;  %705 = vmatpush3.bf16.msra.mxu1 %v704_v30  ;;  %v379_v35 = vmax.f32 %v633_v31, 0.0 }
 0x16e   : > { %v635_v33 = vpop.f32.mrb[15].mxu0  ;;  %706 = vmatprep.subr.bf16.mxu1 %v945_v0 }
 0x16f   : > { %v636_v34 = vadd.f32 %v635_v33, %v634_v32 }
 0x171   : > { %v380_v36 = vmax.f32 %v636_v34, 0.0 }
 0x173   : > { %v707_v37 = vpack.c.bf16 %v380_v36, %v379_v35 }
 0x175   : > { %708 = vmatpush3.bf16.msra.mxu1 %v707_v37 }
 0x178   : > { %663 = vmatmul.mubr.msk.f32.vlgmr.msra.gmra.mrb[0].mxu1 %vm382_vm1, %v381_v38 }
 0x24b   : > { %v452_v39 = vpop.f32.mrb[0].mxu1 }
 0x24c   : > { %v576_v40 = vmul.f32 -1.442695, %v452_v39  ;;  %v664_v41 = vpop.f32.mrb[1].mxu1 }
 0x24e   : > { %789 = vpow2.f32 %v576_v40 }
 0x258   : > { %v790_v42 = vpop.eup %789 }
 0x259   : > { %v459_v43 = vadd.f32 1.0, %v790_v42 }
 0x25b   : > { %791 = vrcp.f32 %v459_v43 }
 0x265   : > { %v792_v44 = vpop.eup %791 }
 0x266   : > { %462 = vst [vmem:[%s219_s9] sm:$0x1] %v792_v44 }
 0x267   : > { %864 = shalt.err (!%p861_p5)
}
 0x268   : > { %s865_s25 = scalar_lea.hbm %s1175_s26, 16  ;;  %s869_s4 = scalar_lea.hbm %s1227_s3, 32 }
 0x269   : > { %p866_p9 = scmp.ne.s32.totalorder %s1175_s26, %s865_s25  ;;  %p870_p3 = scmp.lt.u32.totalorder %s1175_s26, %s1227_s3 }
 0x26a   : > { %p871_p7 = scmp.lt.u32.totalorder %s869_s4, %s865_s25  ;;  %p873_p4 = scmp.lt.u32.totalorder %s865_s25, %s1175_s26 }
 0x26b   : > { %p867_p1 = pnand %p866_p9, %p1065_p10 }
 0x26c   : > { %p872_p13 = por %p871_p7, %p870_p3 }
 0x26d   : > { %p868_p2 = pneg %p867_p1 }
 0x26e   : > { %p874_p6 = por %p873_p4, %p872_p13 }
 0x270   : > { %p875_p8 = pnand %p874_p6, %p868_p2 }
 0x272   : > { %878 = shalt.err (!%p875_p8)
}
 0x273   : > { %715 = dma.vmem_to_hbm [thread:$0]  (%p1065_p10), %s1177_s10, 16, %s1175_s26, %s464_s7  }
 0x274 PF: > { %s489_s22 = sand.u32 1, %s917_s12   ;;  %p1245_p12 = scmp.ne.s32.totalorder %s1235_s23, 0 }
 0x275   : > { %p1246_p11 = scmp.ge.s32.totalorder %s937_s17, 2  ;;  %s490_s24 = scalar_lea.sflag [#allocation4], %s489_s22 }
 0x277   : > { %p726_p0 = pnand %p1246_p11, %p1245_p12 }
 0x279   : > { %912 = dma.done.wait (!%p726_p0), %s490_s24, 16  }
 0x27a   : > { %914 = vsyncadd (!%p726_p0), %s490_s24, 4294967280  ;;  %s20_s17 = sadd.s32 1, %s937_s17   ;;  %s1247_s12 = smov %s921_s13 }
 0x27b   : > { %p17_p5 = scmp.ge.s32.totalorder %s20_s17, 4   ;;  %s1248_s13 = smov %s925_s14 }
 0x27c   : > { %s1249_s14 = smov %s1074_s5  ;;  %s1250_s15 = smov %s933_s16 }
 0x27d   : > { %s1251_s16 = smov %s1253_s28  ;;  %19 = sbr.rel (!%p17_p5) target bundleno = 7 (0x7), region = 81 }
 0x284   :  { %494 = vsyncpa [#allocation3], 1 }
 0x285   :  { %496 = vsyncpa [#allocation3 + $0x1], 1 }
 0x286   :  { %497 = vsyncpa [#allocation6], 1 }
 0x287   :  { %498 = vsyncpa [#allocation4], 1 }
 0x288   :  { %500 = vsyncpa [#allocation4 + $0x1], 1 }

</bundles_post_ra>
